<compile_context>
chip_gen: v6e
topology: v6e:2x2x1
jax: 0.10.0
libtpu: 0.0.40
codegen_flags: <defaults>
</compile_context>

<pallas_src>
import math

import jax
import jax.numpy as jnp
from jax.experimental import pallas as pl
from jax.experimental.pallas import tpu as pltpu


_LANE = 128
_LANE_DENSE_CAP = 16384  # max lane-dense width L; (1, L) f32 scale row <= 64 KiB VMEM


def _default_tile_bytes():
    """Per-generation target bytes for one x tile (in+out double-buffered => ~4x this)."""
    try:
        kind = jax.devices()[0].device_kind.lower()
    except Exception:
        kind = ""
    if "v7" in kind:
        return 6 * 1024 * 1024   # ~3.2 TB/s: amortize the ~0.35us per-step overhead
    if "v6" in kind:
        return 4 * 1024 * 1024   # 4 x 4 MiB = 16 MiB, inside the 32 MiB scoped default
    return 2 * 1024 * 1024       # v5e's 16 MiB scoped default: keep 2 MiB tiles


# ---------------------------------------------------------------------------
# Kernel: out = broadcast(scale) * x, multiply in f32, cast on store.
# scale_ref is either (1, L) (per-lane scale row) or (TM, 1) (per-row column).
# ---------------------------------------------------------------------------
def _layerscale_kernel(scale_ref, x_ref, o_ref):
    o_ref[...] = (x_ref[...].astype(jnp.float32) * scale_ref[...]).astype(o_ref.dtype)


def _cdiv(a, b):
    return -(-a // b)


def _min_row_tile(itemsize):
    # Minimum legal second-minor tile: 8 rows (f32), 16 (bf16/fp16), 32 (int8/fp8).
    return 8 * max(4 // max(itemsize, 1), 1)


def _choose_row_tile(rows, width, itemsize, target_bytes):
    min_tm = _min_row_tile(itemsize)
    if rows <= 2 * min_tm:
        return rows  # tiny input: single block, pipelining cannot help
    row_bytes = max(width * itemsize, 1)
    # Never return the whole array for wide rows: clamp to the legal minimum tile.
    tm = max(target_bytes // row_bytes, min_tm)
    # Guarantee >= 4 pipeline steps when the row count allows it, so prefetch of
    # block i+1 / writeback of i-1 overlap the multiply (and both v7x TCs get work).
    if rows >= 4 * min_tm:
        tm = min(tm, rows // 4)
    tm = max((tm // min_tm) * min_tm, min_tm)
    if tm >= rows:
        return rows
    # Prefer an even grid length so the "parallel" axis splits evenly across the
    # two v7x TensorCores (an odd grid leaves one core with an extra block).
    cand = tm
    for _ in range(8):
        if cand < min_tm:
            break
        if _cdiv(rows, cand) % 2 == 0:
            return cand
        cand -= min_tm
    return tm


# ---------------------------------------------------------------------------
# Row-tiled 2D driver: out[r, l] = x2d[r, l] * broadcast(scale2d)
# scale2d is (1, L) f32 (resident) or (rows, 1) f32 (tiled alongside x).
# ---------------------------------------------------------------------------
def _scale_2d(x2d, scale2d, target_tile_bytes):
    rows, width = x2d.shape
    tm = _choose_row_tile(rows, width, x2d.dtype.itemsize, target_tile_bytes)
    grid = (pl.cdiv(rows, tm),)  # partial tail block handled by Pallas

    s_rows, s_cols = scale2d.shape
    if s_rows == 1:
        # (1, L) per-lane scale row, resident across all grid steps.
        scale_spec = pl.BlockSpec((1, s_cols), lambda i: (0, 0))
    else:
        # (rows, 1) per-row scale column, tiled alongside x.
        scale_spec = pl.BlockSpec((tm, 1), lambda i: (i, 0))

    cost = pl.CostEstimate(
        flops=rows * width,
        transcendentals=0,
        bytes_accessed=2 * rows * width * x2d.dtype.itemsize + scale2d.size * 4,
    )

    return pl.pallas_call(
        _layerscale_kernel,
        out_shape=jax.ShapeDtypeStruct((rows, width), x2d.dtype),
        grid_spec=pltpu.PrefetchScalarGridSpec(
            num_scalar_prefetch=0,
            grid=grid,
            in_specs=[
                scale_spec,
                pl.BlockSpec((tm, width), lambda i: (i, 0)),
            ],
            out_specs=pl.BlockSpec((tm, width), lambda i: (i, 0)),
        ),
        compiler_params=pltpu.CompilerParams(
            # Row tiles are independent: v7x shards them across its 2 TensorCores.
            dimension_semantics=("parallel",),
        ),
        # x (input index 1) may donate its buffer to the output (index 0).
        input_output_aliases={1: 0},
        cost_estimate=cost,
    )(scale2d, x2d)


# ---------------------------------------------------------------------------
# Lane-dense flat path: out.flat[i] = x.flat[i] * pattern[i % period]
# ---------------------------------------------------------------------------
def _lane_dense_flat(x, pattern_f32, period, target_tile_bytes):
    """Returns the scaled array, or None if the lane-dense width exceeds the cap."""
    total = x.size
    L = (period * _LANE) // math.gcd(period, _LANE)  # lcm(period, 128); L % period == 0
    if L > _LANE_DENSE_CAP:
        return None
    flat = x.reshape(total)
    pad = (-total) % L
    if pad:
        # Pad < L elements so every store is an unmasked full-width vst; the
        # padded tail is sliced off after the kernel.
        flat = jnp.pad(flat, (0, pad))
    rows = (total + pad) // L
    x2d = flat.reshape(rows, L)
    scale2d = jnp.tile(pattern_f32, L // period).reshape(1, L)
    out2d = _scale_2d(x2d, scale2d, target_tile_bytes)
    out_flat = out2d.reshape(rows * L)
    if pad:
        out_flat = out_flat[:total]
    return out_flat.reshape(x.shape)


# ---------------------------------------------------------------------------
# channel_last = True : x (T, B, C), scale (C,)  ->  scale * x
# ---------------------------------------------------------------------------
def layerscale_channel_last(x, scale, target_tile_bytes=None):
    if target_tile_bytes is None:
        target_tile_bytes = _default_tile_bytes()
    T, B, C = x.shape
    scale_f32 = scale.astype(jnp.float32)
    out = _lane_dense_flat(x, scale_f32, C, target_tile_bytes)
    if out is not None:
        return out
    # lcm(C, 128) exceeds the cap (very large, non-128-divisible C).  Fall back to
    # (T*B, C) rows; with C this large the masked lane waste is negligible.
    x2d = x.reshape(T * B, C)
    scale2d = scale_f32.reshape(1, C)
    return _scale_2d(x2d, scale2d, target_tile_bytes).reshape(T, B, C)


# ---------------------------------------------------------------------------
# channel_last = False : x (B, C, T), scale (C,)  ->  scale[:, None] * x
# ---------------------------------------------------------------------------
def layerscale_channel_first(x, scale, target_tile_bytes=None):
    if target_tile_bytes is None:
        target_tile_bytes = _default_tile_bytes()
    B, C, T = x.shape
    scale_f32 = scale.astype(jnp.float32)
    # Over the flat (B, C, T) view the per-element scale repeats with period C*T.
    pattern = jnp.repeat(scale_f32, T)  # (C*T,)
    out = _lane_dense_flat(x, pattern, C * T, target_tile_bytes)
    if out is not None:
        return out
    # C*T too large for a resident lane-dense scale row: fall back to (B*C, T) rows
    # with a per-row scale column (masked lane stores if T % 128 != 0, still correct).
    x2d = x.reshape(B * C, T)
    scale_col = jnp.tile(scale_f32, B).reshape(B * C, 1)  # scale_col[b*C + c] = scale[c]
    return _scale_2d(x2d, scale_col, target_tile_bytes).reshape(B, C, T)


# ---------------------------------------------------------------------------
# Module-like wrapper with deterministic parameter init (scale[:] = init).
# ---------------------------------------------------------------------------
class LayerScale:
    def __init__(self, channels: int, init: float = 0.0001, channel_last: bool = True):
        self.channel_last = channel_last
        # nn.Parameter(torch.zeros(channels)); scale.data[:] = init  -- kept in float32.
        self.scale = jnp.full((channels,), init, dtype=jnp.float32)

    def __call__(self, x):
        if self.channel_last:
            return layerscale_channel_last(x, self.scale)
        return layerscale_channel_first(x, self.scale)


if __name__ == "__main__":
    key = jax.random.PRNGKey(0)
    k1, k2, k3, k4, k5, k6 = jax.random.split(key, 6)

    # 1) channel_last, f32, (T, B, C) = (8, 2, 32): lane-dense (4, 128), no padding.
    T, B, C = 8, 2, 32
    x_last = jax.random.normal(k1, (T, B, C), dtype=jnp.float32)
    mod_last = LayerScale(C, init=0.0001, channel_last=True)
    ref_last = mod_last.scale * x_last
    out_last = jax.block_until_ready(mod_last(x_last))
    assert out_last.shape == x_last.shape
    assert jnp.allclose(out_last, ref_last, atol=1e-6, rtol=1e-6)

    # 2) channel_last, f32: total not divisible by L -> padded lane-dense path,
    #    multi-step grid with a partial tail block.
    T2, B2, C2 = 50, 3, 32  # total=4800, L=128, pad=64, rows=38
    x2 = jax.random.normal(k2, (T2, B2, C2), dtype=jnp.float32)
    scale2 = jax.random.normal(k3, (C2,), dtype=jnp.float32) * 1e-2
    ref2 = scale2 * x2
    out2 = jax.block_until_ready(
        layerscale_channel_last(x2, scale2, target_tile_bytes=16 * 1024))
    assert jnp.allclose(out2, ref2, atol=1e-6, rtol=1e-6)

    # 3) channel_last, f32: C not a multiple of 128 -> L = lcm(48,128)=384, even grid.
    T3, B3, C3 = 256, 4, 48
    x3 = jax.random.normal(k4, (T3, B3, C3), dtype=jnp.float32)
    scale3 = jax.random.normal(k5, (C3,), dtype=jnp.float32) * 1e-2
    ref3 = scale3 * x3
    out3 = jax.block_until_ready(
        layerscale_channel_last(x3, scale3, target_tile_bytes=96 * 1024))
    assert jnp.allclose(out3, ref3, atol=1e-6, rtol=1e-6)

    # 4) channel_first, f32, (B, C, T) = (4, 8, 16): lane-dense flat path, L = C*T = 128.
    Bf, Cf, Tf = 4, 8, 16
    x_first = jax.random.normal(k2, (Bf, Cf, Tf), dtype=jnp.float32)
    mod_first = LayerScale(Cf, init=0.0001, channel_last=False)
    ref_first = mod_first.scale[:, None] * x_first
    out_first = jax.block_until_ready(mod_first(x_first))
    assert out_first.shape == x_first.shape
    assert jnp.allclose(out_first, ref_first, atol=1e-6, rtol=1e-6)

    # 5) channel_first, f32, padded lane-dense path (total % lcm(C*T,128) != 0).
    B5, C5, T5 = 5, 8, 12  # C*T=96, L=384, total=480 -> padded to 768
    x5 = jax.random.normal(k5, (B5, C5, T5), dtype=jnp.float32)
    scale5 = jax.random.normal(k6, (C5,), dtype=jnp.float32) * 1e-2
    ref5 = scale5[:, None] * x5
    out5 = jax.block_until_ready(layerscale_channel_first(x5, scale5))
    assert jnp.allclose(out5, ref5, atol=1e-6, rtol=1e-6)

    # 6) channel_first, f32, fallback path (lcm(C*T,128) exceeds the lane-dense cap).
    B6, C6, T6 = 2, 20, 700  # C*T=14000 -> L=112000 > cap -> (B*C, T) row layout
    x6 = jax.random.normal(k1, (B6, C6, T6), dtype=jnp.float32)
    scale6 = jax.random.normal(k3, (C6,), dtype=jnp.float32) * 1e-2
    ref6 = scale6[:, None] * x6
    out6 = jax.block_until_ready(layerscale_channel_first(x6, scale6))
    assert jnp.allclose(out6, ref6, atol=1e-6, rtol=1e-6)

    # 7) channel_last, bf16 activations: f32 multiply in-kernel, cast back to bf16 on store.
    # TODO(synk): strict PyTorch semantics would promote f32-scale * bf16-x to f32;
    # we intentionally keep x.dtype for the output.
    Tb, Bb, Cb = 16, 2, 32
    xb = jax.random.normal(k6, (Tb, Bb, Cb), dtype=jnp.float32).astype(jnp.bfloat16)
    scaleb = jnp.full((Cb,), 0.0001, dtype=jnp.float32)
    refb = (scaleb * xb.astype(jnp.float32)).astype(jnp.bfloat16)
    outb = jax.block_until_ready(layerscale_channel_last(xb, scaleb))
    assert outb.dtype == jnp.bfloat16
    assert jnp.allclose(outb.astype(jnp.float32), refb.astype(jnp.float32),
                        atol=1e-3, rtol=1e-2)

    print("KERNEL_OK")
</pallas_src>

<mosaic_0001>
module attributes {stable_mosaic.version = 11 : i64} {
  func.func @_layerscale_kernel(%arg0: i32, %arg1: memref<1x128xf32, #tpu.memory_space<vmem>>, %arg2: memref<4x128xf32, #tpu.memory_space<vmem>>, %arg3: memref<4x128xf32, #tpu.memory_space<vmem>>) attributes {dimension_semantics = [#tpu.dimension_semantics<parallel>], iteration_bounds = array<i64: 1>, scalar_prefetch = 0 : i64, scratch_operands = 0 : i64, tpu.core_type = #tpu.core_type<tc>, window_params = [{pipeline_mode = #tpu.pipeline_mode<synchronous>, transform_indices = @transform_0, window_bounds = array<i64: 1, 128>}, {transform_indices = @transform_1, window_bounds = array<i64: 4, 128>}, {transform_indices = @transform_2, window_bounds = array<i64: 4, 128>}]} {
    %c0 = arith.constant 0 : index
    %c0_0 = arith.constant 0 : index
    %0 = vector.load %arg2[%c0, %c0_0] : memref<4x128xf32, #tpu.memory_space<vmem>>, vector<4x128xf32>
    %c0_1 = arith.constant 0 : index
    %c0_2 = arith.constant 0 : index
    %1 = vector.load %arg1[%c0_1, %c0_2] : memref<1x128xf32, #tpu.memory_space<vmem>>, vector<1x128xf32>
    %2 = vector.broadcast %1 : vector<1x128xf32> to vector<4x128xf32>
    %3 = arith.mulf %0, %2 : vector<4x128xf32>
    %c0_3 = arith.constant 0 : index
    %c0_4 = arith.constant 0 : index
    %4 = vector.load %arg3[%c0_3, %c0_4] : memref<4x128xf32, #tpu.memory_space<vmem>>, vector<4x128xf32>
    tpu.vector_store %arg3[%c0_3, %c0_4], %3 {strides = array<i32>} : memref<4x128xf32, #tpu.memory_space<vmem>>, vector<4x128xf32>,
    return
  }
  func.func @transform_0(%arg0: i32) -> (i32, i32) {
    %c0_i32 = arith.constant 0 : i32
    %c0_i32_0 = arith.constant 0 : i32
    %c0_i32_1 = arith.constant 0 : i32
    return %c0_i32, %c0_i32_0 : i32, i32
  }
  func.func @transform_1(%arg0: i32) -> (i32, i32) {
    %c0_i32 = arith.constant 0 : i32
    %c0_i32_0 = arith.constant 0 : i32
    return %arg0, %c0_i32 : i32, i32
  }
  func.func @transform_2(%arg0: i32) -> (i32, i32) {
    %c0_i32 = arith.constant 0 : i32
    %c0_i32_0 = arith.constant 0 : i32
    return %arg0, %c0_i32 : i32, i32
  }
}

</mosaic_0001>

<bundles_post_ra>
// kernel: tpu_custom_call.1
= control target key start
LH: loop header
LB: loop body
LE: loop exit
PB: predicated region body
PF: predicated region fallthrough
CT: control target
= control target key end

     0   :  { %7 = vsyncpa [#allocation3], 0  ;;  %s122_s0 = inlined_call_operand.vmem [shape: f32[1,128], index: 0, kind: input, shape index: {}]   ;;  %s123_s1 = inlined_call_operand.hbm [shape: f32[4,128], index: 1, kind: input, shape index: {}, may-alias: {1,2}]   ;;  %s124_s2 = inlined_call_operand.hbm [shape: f32[4,128], index: 2, kind: output, shape index: {}, may-alias: {1,2}]  }
   0x1   :  { %8 = vsyncpa [#allocation4], 0  ;;  %s96_s9 = smov [#allocation2]  }
   0x2   :  { %s17_s10 = sshll.u32 %s96_s9, 4  ;;  %s18_s10 = int_to_ptr.vmem [resolvable:$true] %s17_s10 }
   0x3   :  { %s60_s11 = scalar_lea.vmem %s18_s10, 64  ;;  %p65_p1 = scmp.lt.s32.totalorder %s18_s10, %s18_s10 }
   0x4   :  { %p61_p0 = scmp.ne.s32.totalorder %s18_s10, %s60_s11  ;;  %p66_p2 = scmp.lt.s32.totalorder %s60_s11, %s60_s11 }
   0x6   :  { %p67_p3 = por %p66_p2, %p65_p1 }
   0x8   :  { %p68_p4 = pnand %p67_p3, %p61_p0 }
   0xa   :  { %71 = shalt.err (!%p68_p4)
}
   0xb   :  { %20 = dma.hbm_to_vmem [thread:$0]  %s123_s1, 64, %s18_s10, [#allocation3]  }
   0xc   :  { %92 = dma.done.wait [#allocation3], 64  }
   0xd   :  { %93 = vsyncadd [#allocation3], 4294967232  ;;  %s97_s14 = smov [#allocation5]   ;;  %v24_v0 = vld [vmem:[#allocation2] sm:$0xf] }
   0xe   :  { %s40_s15 = sshll.u32 %s97_s14, 4  ;;  %v49_v1 = vld [vmem:[%s122_s0] ss:$0 sm:$0xff]  ;;  %s41_s15 = int_to_ptr.vmem [resolvable:$true] %s40_s15 }
   0xf   :  { %v32_v2 = vmul.f32 %v49_v1, %v24_v0  ;;  %s72_s18 = scalar_lea.vmem %s41_s15, 64  ;;  %p77_p6 = scmp.lt.s32.totalorder %s41_s15, %s41_s15 }
  0x10   :  { %p73_p5 = scmp.ne.s32.totalorder %s41_s15, %s72_s18  ;;  %p78_p7 = scmp.lt.s32.totalorder %s72_s18, %s72_s18 }
  0x11   :  { %33 = vst [vmem:[#allocation5] sm:$0xf] %v32_v2 }
  0x12   :  { %p79_p8 = por %p78_p7, %p77_p6 }
  0x14   :  { %p80_p9 = pnand %p79_p8, %p73_p5 }
  0x16   :  { %83 = shalt.err (!%p80_p9)
}
  0x17   :  { %43 = dma.vmem_to_hbm [thread:$0]  %s41_s15, 64, %s124_s2, [#allocation4]  }
  0x18   :  { %94 = dma.done.wait [#allocation4], 64  }
  0x19   :  { %95 = vsyncadd [#allocation4], 4294967232 }
  0x1a   :  { %47 = vsyncpa [#allocation3], 1 }
  0x1b   :  { %48 = vsyncpa [#allocation4], 1 }

</bundles_post_ra>
